<compile_context>
chip_gen: v7x
topology: tpu7x:2x2x1
jax: 0.10.0
libtpu: 0.0.40
codegen_flags: <defaults>
</compile_context>

<pallas_src>
import math

import jax
import jax.numpy as jnp
from jax.experimental import pallas as pl
from jax.experimental.pallas import tpu as pltpu


def _actor_forward_kernel(x_ref, w1_ref, b1_ref, w2_ref, b2_ref, out_ref):
    # x_ref:  (block_b, num_inputs)    VMEM
    # w1_ref: (num_inputs, hidden)     VMEM (resident across the whole grid)
    # b1_ref: (1, hidden)              VMEM
    # w2_ref: (1, hidden)              VMEM  (second-layer weight as a row)
    # b2_ref: (1, 1)                   SMEM  (scalar)
    # out_ref:(block_b, 128)           VMEM  (lane-dense; col 0 holds the result)
    x = x_ref[...]
    h = jnp.dot(x, w1_ref[...], preferred_element_type=jnp.float32)  # MXU
    h = jnp.tanh(h + b1_ref[...])                                    # EUP/VPU
    # Second layer: VPU elementwise multiply + XLU lane reduction (f32).
    y = jnp.sum(h * w2_ref[...], axis=-1, keepdims=True)             # (block_b, 1)
    y = y + b2_ref[0, 0]                                             # scalar from SMEM
    # Lane-dense store: broadcast the scalar across 128 lanes; wrapper slices col 0.
    out_ref[...] = jnp.broadcast_to(y, out_ref.shape)


def actor_forward(x, w1_t, b1, w2_row, b2, *, block_b=128):
    """Batched actor forward.

    x:      (B, num_inputs) f32
    w1_t:   (num_inputs, hidden) f32   (PyTorch linear1.weight transposed)
    b1:     (1, hidden) f32
    w2_row: (1, hidden) f32            (PyTorch linear2.weight, shape (1, hidden))
    b2:     (1, 1) f32
    returns (B, 1) f32
    """
    B, num_inputs = x.shape
    hidden = w1_t.shape[1]

    # Pad batch up to a multiple of the batch tile so any B (incl. B=1) works.
    Bp = max(block_b, ((B + block_b - 1) // block_b) * block_b)
    if Bp != B:
        x = jnp.pad(x, ((0, Bp - B), (0, 0)))
    grid = (Bp // block_b,)

    out_padded = pl.pallas_call(
        _actor_forward_kernel,
        out_shape=jax.ShapeDtypeStruct((Bp, 128), jnp.float32),
        grid=grid,
        in_specs=[
            pl.BlockSpec((block_b, num_inputs), lambda i: (i, 0),
                         memory_space=pltpu.MemorySpace.VMEM),
            pl.BlockSpec((num_inputs, hidden), lambda i: (0, 0),
                         memory_space=pltpu.MemorySpace.VMEM),
            pl.BlockSpec((1, hidden), lambda i: (0, 0),
                         memory_space=pltpu.MemorySpace.VMEM),
            pl.BlockSpec((1, hidden), lambda i: (0, 0),
                         memory_space=pltpu.MemorySpace.VMEM),
            pl.BlockSpec(memory_space=pltpu.MemorySpace.SMEM),  # b2 scalar
        ],
        out_specs=pl.BlockSpec((block_b, 128), lambda i: (i, 0),
                               memory_space=pltpu.MemorySpace.VMEM),
        compiler_params=pltpu.CompilerParams(
            # Batch axis is embarrassingly parallel: v7x splits it over 2 TCs.
            dimension_semantics=("parallel",),
        ),
    )(x, w1_t, b1, w2_row, b2)

    # Lane-dense output block; the actual scalar lives in column 0.
    return out_padded[:B, :1]


def init_params(key, num_inputs, hidden_size):
    """nn.Linear-style init: U(-1/sqrt(fan_in), 1/sqrt(fan_in)).

    hidden_size=32 already pads to a full 128-lane vreg in hardware; pad the
    model to 128 hidden units only if the extra capacity is actually wanted.
    """
    k1, k2, k3, k4 = jax.random.split(key, 4)
    bound1 = 1.0 / math.sqrt(num_inputs)
    bound2 = 1.0 / math.sqrt(hidden_size)
    # W1 stored transposed relative to PyTorch (in, out); W2 kept as a row (1, hidden).
    w1_t = jax.random.uniform(k1, (num_inputs, hidden_size), jnp.float32,
                              -bound1, bound1)
    b1 = jax.random.uniform(k2, (1, hidden_size), jnp.float32, -bound1, bound1)
    w2_row = jax.random.uniform(k3, (1, hidden_size), jnp.float32, -bound2, bound2)
    b2 = jax.random.uniform(k4, (1, 1), jnp.float32, -bound2, bound2)
    return w1_t, b1, w2_row, b2


def _reference(x, w1_t, b1, w2_row, b2):
    return jnp.tanh(x @ w1_t + b1) @ w2_row.T + b2


if __name__ == "__main__":
    num_inputs = 8
    hidden_size = 32

    key = jax.random.PRNGKey(0)
    pkey, xkey, skey = jax.random.split(key, 3)
    w1_t, b1, w2_row, b2 = init_params(pkey, num_inputs, hidden_size)

    # 1) Batched policy evaluation (the hot path worth a kernel): B=256 states.
    batch = 256
    xb = jax.random.normal(xkey, (batch, num_inputs), jnp.float32)
    out_b = jax.block_until_ready(actor_forward(xb, w1_t, b1, w2_row, b2))
    ref_b = _reference(xb, w1_t, b1, w2_row, b2)
    assert out_b.shape == (batch, 1)
    assert jnp.allclose(out_b, ref_b, atol=1e-5, rtol=1e-5)

    # 2) Torch-style single state: forward() unsqueezes one state to (1, num_inputs).
    state = jax.random.normal(skey, (num_inputs,), jnp.float32)
    x1 = state[None, :]
    out_1 = jax.block_until_ready(actor_forward(x1, w1_t, b1, w2_row, b2))
    ref_1 = _reference(x1, w1_t, b1, w2_row, b2)
    assert out_1.shape == (1, 1)
    assert jnp.allclose(out_1, ref_1, atol=1e-5, rtol=1e-5)

    # TODO(synk): get_action's torch.normal sampling / log-prob and the Adam
    # optimizer are host-side glue, not part of the forward hot path; omitted.
    print("KERNEL_OK")
</pallas_src>

<mosaic_0001>
module attributes {stable_mosaic.version = 11 : i64} {
  func.func @_actor_forward_kernel(%arg0: i32, %arg1: memref<128x8xf32, #tpu.memory_space<vmem>>, %arg2: memref<8x32xf32, #tpu.memory_space<vmem>>, %arg3: memref<1x32xf32, #tpu.memory_space<vmem>>, %arg4: memref<1x32xf32, #tpu.memory_space<vmem>>, %arg5: memref<1x1xf32, #tpu.memory_space<smem>>, %arg6: memref<128x128xf32, #tpu.memory_space<vmem>>) attributes {dimension_semantics = [#tpu.dimension_semantics<parallel>], iteration_bounds = array<i64: 2>, scalar_prefetch = 0 : i64, scratch_operands = 0 : i64, tpu.core_type = #tpu.core_type<tc>, window_params = [{transform_indices = @transform_0, window_bounds = array<i64: 128, 8>}, {pipeline_mode = #tpu.pipeline_mode<synchronous>, transform_indices = @transform_1, window_bounds = array<i64: 8, 32>}, {pipeline_mode = #tpu.pipeline_mode<synchronous>, transform_indices = @transform_2, window_bounds = array<i64: 1, 32>}, {pipeline_mode = #tpu.pipeline_mode<synchronous>, transform_indices = @transform_3, window_bounds = array<i64: 1, 32>}, {transform_indices = @transform_4, window_bounds = array<i64: 1, 1>}, {transform_indices = @transform_5, window_bounds = array<i64: 128, 128>}]} {
    %c0 = arith.constant 0 : index
    %c0_0 = arith.constant 0 : index
    %0 = vector.load %arg1[%c0, %c0_0] : memref<128x8xf32, #tpu.memory_space<vmem>>, vector<128x8xf32>
    %c0_1 = arith.constant 0 : index
    %c0_2 = arith.constant 0 : index
    %1 = vector.load %arg2[%c0_1, %c0_2] : memref<8x32xf32, #tpu.memory_space<vmem>>, vector<8x32xf32>
    %cst = arith.constant dense<0.000000e+00> : vector<128x32xf32>
    %2 = tpu.matmul %0, %1, %cst {dimension_numbers = #tpu.dot_dimension_numbers<[1], [0], [0], [1], [0, 0, 1, 1], [], []>} : vector<128x8xf32>, vector<8x32xf32>, vector<128x32xf32> -> vector<128x32xf32>
    %c0_3 = arith.constant 0 : index
    %c0_4 = arith.constant 0 : index
    %3 = vector.load %arg3[%c0_3, %c0_4] : memref<1x32xf32, #tpu.memory_space<vmem>>, vector<1x32xf32>
    %4 = vector.broadcast %3 : vector<1x32xf32> to vector<128x32xf32>
    %5 = arith.addf %2, %4 : vector<128x32xf32>
    %6 = math.tanh %5 : vector<128x32xf32>
    %c0_5 = arith.constant 0 : index
    %c0_6 = arith.constant 0 : index
    %7 = vector.load %arg4[%c0_5, %c0_6] : memref<1x32xf32, #tpu.memory_space<vmem>>, vector<1x32xf32>
    %8 = vector.broadcast %7 : vector<1x32xf32> to vector<128x32xf32>
    %9 = arith.mulf %6, %8 : vector<128x32xf32>
    %cst_7 = arith.constant dense<0.000000e+00> : vector<128xf32>
    %10 = vector.multi_reduction <add>, %9, %cst_7 [1] : vector<128x32xf32> to vector<128xf32>
    %11 = vector.shape_cast %10 : vector<128xf32> to vector<128x1xf32>
    %c0_8 = arith.constant 0 : index
    %c0_9 = arith.constant 0 : index
    %12 = memref.load %arg5[%c0_8, %c0_9] : memref<1x1xf32, #tpu.memory_space<smem>>
    %13 = vector.broadcast %12 : f32 to vector<128x1xf32>
    %14 = arith.addf %11, %13 : vector<128x1xf32>
    %15 = vector.shape_cast %14 : vector<128x1xf32> to vector<128x1xf32>
    %16 = vector.broadcast %15 : vector<128x1xf32> to vector<128x128xf32>
    %c0_10 = arith.constant 0 : index
    %c0_11 = arith.constant 0 : index
    %17 = vector.load %arg6[%c0_10, %c0_11] : memref<128x128xf32, #tpu.memory_space<vmem>>, vector<128x128xf32>
    tpu.vector_store %arg6[%c0_10, %c0_11], %16 {strides = array<i32>} : memref<128x128xf32, #tpu.memory_space<vmem>>, vector<128x128xf32>,
    return
  }
  func.func @transform_0(%arg0: i32) -> (i32, i32) {
    %c0_i32 = arith.constant 0 : i32
    %c0_i32_0 = arith.constant 0 : i32
    return %arg0, %c0_i32 : i32, i32
  }
  func.func @transform_1(%arg0: i32) -> (i32, i32) {
    %c0_i32 = arith.constant 0 : i32
    %c0_i32_0 = arith.constant 0 : i32
    %c0_i32_1 = arith.constant 0 : i32
    return %c0_i32, %c0_i32_0 : i32, i32
  }
  func.func @transform_2(%arg0: i32) -> (i32, i32) {
    %c0_i32 = arith.constant 0 : i32
    %c0_i32_0 = arith.constant 0 : i32
    %c0_i32_1 = arith.constant 0 : i32
    return %c0_i32, %c0_i32_0 : i32, i32
  }
  func.func @transform_3(%arg0: i32) -> (i32, i32) {
    %c0_i32 = arith.constant 0 : i32
    %c0_i32_0 = arith.constant 0 : i32
    %c0_i32_1 = arith.constant 0 : i32
    return %c0_i32, %c0_i32_0 : i32, i32
  }
  func.func @transform_4(%arg0: i32) -> (i32, i32) {
    %c0_i32 = arith.constant 0 : i32
    %c0_i32_0 = arith.constant 0 : i32
    %c0_i32_1 = arith.constant 0 : i32
    return %c0_i32, %c0_i32_0 : i32, i32
  }
  func.func @transform_5(%arg0: i32) -> (i32, i32) {
    %c0_i32 = arith.constant 0 : i32
    %c0_i32_0 = arith.constant 0 : i32
    return %arg0, %c0_i32 : i32, i32
  }
}

</mosaic_0001>

<bundles_post_ra>
// kernel: tpu_custom_call.1
= control target key start
LH: loop header
LB: loop body
LE: loop exit
PB: predicated region body
PF: predicated region fallthrough
CT: control target
= control target key end

     0   :  { %s1094_s0 = inlined_call_operand.vmem [shape: f32[256,8], index: 0, kind: input, shape index: {}]   ;;  %s1095_s1 = inlined_call_operand.vmem [shape: f32[8,32], index: 1, kind: input, shape index: {}]   ;;  %s1096_s2 = inlined_call_operand.vmem [shape: f32[1,32], index: 2, kind: input, shape index: {}]   ;;  %s1097_s3 = inlined_call_operand.vmem [shape: f32[1,32], index: 3, kind: input, shape index: {}]   ;;  %s1098_s4 = inlined_call_operand.<no memory space> [shape: f32[1,1], index: 4, kind: input, shape index: {}]   ;;  %s1099_s5 = inlined_call_operand.hbm [shape: f32[256,128], index: 5, kind: output, shape index: {}]  }
   0x1   :  { %10 = sst [smem:[#allocation2]] %s1098_s4 }
   0x2   :  { %11 = vsyncpa [#allocation4], 0 }
   0x3   :  { %13 = vsyncpa [#allocation4 + $0x1], 0  ;;  %s892_s20 = smov 0   ;;  %s894_s21 = smov 0  }
   0x4   :  { %s896_s22 = smov 0   ;;  %s898_s23 = smov 0  }
   0x5 LB: > { %s913_s4 = sadd.s32 4294967295, %s854_s23   ;;  %s643_s24 = sadd.s32 4294967294, %s854_s23   ;;  %s854_s23 = sphi %s898_s23, %s1105_s23   ;;  %s850_s22 = sphi %s896_s22, %s1104_s22   ;;  %s846_s21 = sphi %s894_s21, %s1103_s21   ;;  %s842_s20 = sphi %s892_s20, %s1102_s20  }
   0x6   : > { %s917_s25 = sadd.s32 1, %s854_s23   ;;  %s136_s26 = sadd.s32 1, %s850_s22 }
   0x7   : > { %s133_s27 = ssub.s32 %s854_s23, %s917_s25  ;;  %p146_p0 = scmp.ne.s32.totalorder %s850_s22, %s846_s21 }
   0x8   : > { %p134_p1 = scmp.eq.s32.totalorder %s133_s27, 0  ;;  %p147_p2 = scmp.eq.s32.totalorder %s913_s4, 1 }
   0x9   : > { %p152_p3 = scmp.ne.s32.totalorder %s846_s21, %s842_s20  ;;  %p153_p4 = scmp.eq.s32.totalorder %s643_s24, 1 }
   0xa   : > { %s928_s28 = scalar_select %p134_p1, %s850_s22, %s136_s26  }
   0xb   : > { %p930_p5 = por %p147_p2, %p146_p0  ;;  %p934_p6 = por %p153_p4, %p152_p3 }
   0xc   : > { %p646_p7 = scmp.ge.s32.totalorder %s854_s23, 1  ;;  %p192_p8 = scmp.lt.s32.totalorder %s854_s23, 3 }
   0xe   : > { %p193_p9 = pnand %p646_p7, %p192_p8 }
   0xf   : > { %v243_v0 = vld [vmem:[%s1095_s1] sm:$0xff] (!%p193_p9)  ;;  %s648_s8 = sshll.u32 (!%p193_p9), %s913_s4, 4  ;;  %vm251_vm0 = vcmask (!%p193_p9), 64512   ;;  %vm484_vm1 = vcmask (!%p193_p9), 261120   ;;  %s533_s17 = sld [smem:[#allocation2]] (!%p193_p9) }
  0x10   : > { %196 = sbr.rel (%p193_p9) target bundleno = 445 (0x1bd), region = 40  ;;  %691 = vmatprep.subr.mxu0 (!%p193_p9), %v243_v0  ;;  %717 = vmatprep.subr.mxu1 (!%p193_p9), %v243_v0  ;;  %p221_p10 = scmp.lt.s32.totalorder (!%p193_p9), %s648_s8, 31  ;;  %v966_v17 = vld [vmem:[%s1096_s2] ss:$0 sm:$0xff] (!%p193_p9) }
  0x11   : > { %692 = vmatpush3.msra.mxu0 (!%p193_p9), %v243_v0  ;;  %718 = vmatpush3.msra.mxu1 (!%p193_p9), %v243_v0  ;;  %v981_v40 = vld [vmem:[%s1097_s3] ss:$0 sm:$0xff] (!%p193_p9)  ;;  %s217_s18 = sand.u32 (!%p193_p9), 1, %s846_s21   ;;  %s673_s26 = sshll.u32 (!%p193_p9), %s913_s4, 11 }
  0x12   : > { %s647_s19 = sshll.u32 (!%p193_p9), %s217_s18, 7  ;;  %s1053_s4 = scalar_lea.sflag (!%p193_p9), [#allocation4], %s217_s18 }
  0x13   : > { %s1024_s24 = scalar_lea.vmem (!%p193_p9), [#allocation3], %s647_s19  ;;  %s856_s10 = smov (!%p193_p9), [#allocation3]  }
  0x14   : > { %s581_s27 = sshll.u32 (!%p193_p9), %s1024_s24, 4  ;;  %s796_s11 = sshll.u32 (!%p193_p9), %s856_s10, 4  ;;  %s1047_s27 = int_to_ptr.vmem [resolvable:$true] %s581_s27  ;;  %s797_s11 = int_to_ptr.vmem [resolvable:$false] %s796_s11 }
  0x15   : > { %p799_p0 = scmp.lt.s32.totalorder (!%p193_p9), %s1047_s27, %s797_s11 }
  0x17   : > { %s1107_s8 = smov (!%p221_p10, %s648_s8), 31 }
  0x18   : > { %s649_s9 = sshll.u32 %s1107_s8, 3  ;;  %s1045_s8 = scalar_lea.hbm %s1099_s5, %s673_s26 }
  0x19   : > { %s224_s12 = scalar_lea.vmem %s1094_s0, %s649_s9  ;;  %s792_s9 = scalar_lea.vmem %s1047_s27, 2048 }
  0x1a   : > { %v227_v1 = vld [vmem:[%s224_s12] sm:$0xff]  ;;  %v228_v3 = vld [vmem:[%s224_s12 + $0x8] sm:$0xff]  ;;  %v229_v5 = vld [vmem:[%s224_s12 + $0x10] sm:$0xff]  ;;  %p793_p11 = scmp.ne.s32.totalorder %s1047_s27, %s792_s9 }
  0x1b   : > { %v235_v2 = vld [vmem:[%s224_s12 + $0x40] sm:$0xff]  ;;  %693 = vmatprep.mubr.msk.f32.mxu0 %vm251_vm0, %v227_v1  ;;  %v236_v4 = vld [vmem:[%s224_s12 + $0x48] sm:$0xff]  ;;  %v237_v6 = vld [vmem:[%s224_s12 + $0x50] sm:$0xff] }
  0x1c   : > { %705 = vmatprep.mubr.msk.f32.mxu1 %vm251_vm0, %v235_v2  ;;  %694 = vmatmul.mubr.msk.f32.vlgmr.msra.gmra.mrb[0].mxu0 %vm251_vm0, %v228_v3  ;;  %v230_v7 = vld [vmem:[%s224_s12 + $0x18] sm:$0xff]  ;;  %v231_v9 = vld [vmem:[%s224_s12 + $0x20] sm:$0xff]  ;;  %v232_v11 = vld [vmem:[%s224_s12 + $0x28] sm:$0xff]  ;;  %p794_p12 = pnand %p793_p11, %p930_p5 }
  0x1d   : > { %706 = vmatmul.mubr.msk.f32.vlgmr.msra.gmra.mrb[0].mxu1 %vm251_vm0, %v236_v4  ;;  %696 = vmatprep.mubr.msk.f32.mxu0 %vm251_vm0, %v229_v5  ;;  %v238_v8 = vld [vmem:[%s224_s12 + $0x58] sm:$0xff]  ;;  %v239_v10 = vld [vmem:[%s224_s12 + $0x60] sm:$0xff]  ;;  %v240_v12 = vld [vmem:[%s224_s12 + $0x68] sm:$0xff] }
  0x1e   : > { %708 = vmatprep.mubr.msk.f32.mxu1 %vm251_vm0, %v237_v6  ;;  %v233_v13 = vld [vmem:[%s224_s12 + $0x30] sm:$0xff]  ;;  %v234_v15 = vld [vmem:[%s224_s12 + $0x38] sm:$0xff]  ;;  %p795_p13 = pneg %p794_p12 }
  0x1f   : > { %v241_v14 = vld [vmem:[%s224_s12 + $0x70] sm:$0xff]  ;;  %v242_v16 = vld [vmem:[%s224_s12 + $0x78] sm:$0xff]  ;;  %s798_s12 = scalar_lea.vmem %s797_s11, 4096 }
  0x20   : > { %697 = vmatmul.mubr.msk.f32.gmra.mrb[2].mxu0 %vm251_vm0, %v230_v7  ;;  %p800_p1 = scmp.lt.s32.totalorder %s798_s12, %s792_s9 }
  0x21   : > { %709 = vmatmul.mubr.msk.f32.gmra.mrb[2].mxu1 %vm251_vm0, %v238_v8  ;;  %699 = vmatprep.mubr.msk.f32.mxu0 %vm251_vm0, %v231_v9 }
  0x22   : > { %711 = vmatprep.mubr.msk.f32.mxu1 %vm251_vm0, %v239_v10  ;;  %p801_p2 = por %p800_p1, %p799_p0 }
  0x24   : > { %700 = vmatmul.mubr.msk.f32.gmra.mrb[4].mxu0 %vm251_vm0, %v232_v11  ;;  %p802_p3 = pnand %p801_p2, %p795_p13 }
  0x25   : > { %712 = vmatmul.mubr.msk.f32.gmra.mrb[4].mxu1 %vm251_vm0, %v240_v12  ;;  %702 = vmatprep.mubr.msk.f32.mxu0 %vm251_vm0, %v233_v13 }
  0x26   : > { %714 = vmatprep.mubr.msk.f32.mxu1 %vm251_vm0, %v241_v14 }
  0x28   : > { %703 = vmatmul.mubr.msk.f32.gmra.mrb[6].mxu0 %vm251_vm0, %v234_v15 }
  0x29   : > { %715 = vmatmul.mubr.msk.f32.gmra.mrb[6].mxu1 %vm251_vm0, %v242_v16 }
  0xef   : > { %v695_v18 = vpop.f32.mrb[0].mxu0 }
  0xf0   : > { %v707_v19 = vpop.f32.mrb[0].mxu1  ;;  %v372_v20 = vadd.f32 %v695_v18, %v966_v17  ;;  %v366_v22 = vpop.f32.mrb[1].mxu0 }
  0xf1   : > { %v412_v21 = vadd.f32 %v707_v19, %v966_v17  ;;  %v406_v23 = vpop.f32.mrb[1].mxu1  ;;  %v367_v24 = vadd.f32 %v966_v17, %v366_v22 }
  0xf2   : > { %v407_v25 = vadd.f32 %v966_v17, %v406_v23  ;;  %760 = vtanh.f32 %v372_v20 }
  0xf3   : > { %762 = vtanh.f32 %v412_v21  ;;  %v698_v26 = vpop.f32.mrb[2].mxu0 }
  0xf4   : > { %v710_v27 = vpop.f32.mrb[2].mxu1  ;;  %764 = vtanh.f32 %v367_v24  ;;  %v382_v28 = vadd.f32 %v698_v26, %v966_v17  ;;  %v376_v29 = vpop.f32.mrb[3].mxu0 }
  0xf5   : > { %v422_v30 = vadd.f32 %v710_v27, %v966_v17  ;;  %v416_v31 = vpop.f32.mrb[3].mxu1  ;;  %766 = vtanh.f32 %v407_v25  ;;  %v377_v33 = vadd.f32 %v966_v17, %v376_v29 }
  0xf6   : > { %768 = vtanh.f32 %v382_v28  ;;  %v417_v32 = vadd.f32 %v966_v17, %v416_v31 }
  0xf7   : > { %v701_v34 = vpop.f32.mrb[4].mxu0  ;;  %770 = vtanh.f32 %v422_v30 }
  0xf8   : > { %v713_v35 = vpop.f32.mrb[4].mxu1  ;;  %v386_v36 = vpop.f32.mrb[5].mxu0  ;;  %v392_v38 = vadd.f32 %v701_v34, %v966_v17  ;;  %772 = vtanh.f32 %v417_v32 }
  0xf9   : > { %v426_v37 = vpop.f32.mrb[5].mxu1  ;;  %v387_v39 = vadd.f32 %v966_v17, %v386_v36  ;;  %774 = vtanh.f32 %v377_v33  ;;  %v432_v49 = vadd.f32 %v713_v35, %v966_v17  ;;  %v534_v35 = vstv %s533_s17 }
  0xfa   : > { %v427_v44 = vadd.f32 %v966_v17, %v426_v37 }
  0xfb   : > { %v704_v41 = vpop.f32.mrb[6].mxu0  ;;  %776 = vtanh.f32 %v387_v39 }
  0xfc   : > { %v716_v42 = vpop.f32.mrb[6].mxu1  ;;  %v761_v43 = vpop.eup %760  ;;  %778 = vtanh.f32 %v392_v38  ;;  %v402_v59 = vadd.f32 %v704_v41, %v966_v17 }
  0xfd   : > { %v396_v45 = vpop.f32.mrb[7].mxu0  ;;  %v436_v46 = vpop.f32.mrb[7].mxu1  ;;  %v469_v48 = vmul.f32 %v761_v43, %v981_v40  ;;  %780 = vtanh.f32 %v427_v44  ;;  %v442_v4 = vadd.f32 %v716_v42, %v966_v17 }
  0xfe   : > { %v763_v47 = vpop.eup %762  ;;  %v397_v57 = vadd.f32 %v966_v17, %v396_v45  ;;  %782 = vtanh.f32 %v432_v49  ;;  %v437_v2 = vadd.f32 %v966_v17, %v436_v46 }
  0xff   : > { %v765_v50 = vpop.eup %764  ;;  %v477_v51 = vmul.f32 %v763_v47, %v981_v40  ;;  %v488_v53 = vsel %vm484_vm1, %v469_v48, 0.0 }
 0x100   : > { %v767_v52 = vpop.eup %766  ;;  %v468_v54 = vmul.f32 %v765_v50, %v981_v40  ;;  %489 = vadd.xlane.f32.xlu0 %v488_v53  ;;  %784 = vtanh.f32 %v397_v57 }
 0x101   : > { %v769_v55 = vpop.eup %768  ;;  %v512_v56 = vsel %vm484_vm1, %v477_v51, 0.0  ;;  %v476_v0 = vmul.f32 %v767_v52, %v981_v40  ;;  %786 = vtanh.f32 %v402_v59 }
 0x102   : > { %513 = vadd.xlane.f32.xlu1 %v512_v56  ;;  %v471_v58 = vmul.f32 %v769_v55, %v981_v40  ;;  %v771_v60 = vpop.eup %770  ;;  %v485_v62 = vsel %vm484_vm1, %v468_v54, 0.0  ;;  %788 = vtanh.f32 %v437_v2 }
 0x103   : > { %v479_v63 = vmul.f32 %v771_v60, %v981_v40  ;;  %v773_v1 = vpop.eup %772  ;;  %v509_v8 = vsel %vm484_vm1, %v476_v0, 0.0  ;;  %790 = vtanh.f32 %v442_v4 }
 0x104   : > { %v494_v61 = vsel %vm484_vm1, %v471_v58, 0.0  ;;  %486 = vadd.xlane.f32.xlu0 %v485_v62  ;;  %v775_v3 = vpop.eup %774  ;;  %v478_v9 = vmul.f32 %v773_v1, %v981_v40 }
 0x105   : > { %v777_v5 = vpop.eup %776  ;;  %v518_v6 = vsel %vm484_vm1, %v479_v63, 0.0  ;;  %v470_v10 = vmul.f32 %v775_v3, %v981_v40 }
 0x106   : > { %495 = vadd.xlane.f32.xlu1 %v494_v61  ;;  %v779_v7 = vpop.eup %778  ;;  %v472_v11 = vmul.f32 %v777_v5, %v981_v40  ;;  %v515_v15 = vsel %vm484_vm1, %v478_v9, 0.0 }
 0x107   : > { %v781_v12 = vpop.eup %780  ;;  %v473_v13 = vmul.f32 %v779_v7, %v981_v40  ;;  %v491_v16 = vsel %vm484_vm1, %v470_v10, 0.0 }
 0x108   : > { %510 = vadd.xlane.f32.xlu0 %v509_v8  ;;  %v783_v14 = vpop.eup %782  ;;  %v497_v17 = vsel %vm484_vm1, %v472_v11, 0.0  ;;  %v480_v18 = vmul.f32 %v781_v12, %v981_v40 }
 0x109   : > { %v500_v20 = vsel %vm484_vm1, %v473_v13, 0.0  ;;  %v481_v21 = vmul.f32 %v783_v14, %v981_v40 }
 0x10a   : > { %519 = vadd.xlane.f32.xlu1 %v518_v6  ;;  %v785_v19 = vpop.eup %784  ;;  %v521_v23 = vsel %vm484_vm1, %v480_v18, 0.0 }
 0x10b   : > { %v787_v22 = vpop.eup %786  ;;  %v474_v24 = vmul.f32 %v785_v19, %v981_v40  ;;  %v524_v26 = vsel %vm484_vm1, %v481_v21, 0.0 }
 0x10c   : > { %516 = vadd.xlane.f32.xlu0 %v515_v15  ;;  %v789_v25 = vpop.eup %788  ;;  %v475_v27 = vmul.f32 %v787_v22, %v981_v40 }
 0x10d   : > { %v791_v28 = vpop.eup %790  ;;  %v503_v29 = vsel %vm484_vm1, %v474_v24, 0.0  ;;  %v482_v30 = vmul.f32 %v789_v25, %v981_v40 }
 0x10e   : > { %492 = vadd.xlane.f32.xlu1 %v491_v16  ;;  %v506_v31 = vsel %vm484_vm1, %v475_v27, 0.0  ;;  %v483_v32 = vmul.f32 %v791_v28, %v981_v40 }
 0x10f   : > { %v527_v33 = vsel %vm484_vm1, %v482_v30, 0.0 }
 0x110   : > { %498 = vadd.xlane.f32.xlu0 %v497_v17  ;;  %v530_v34 = vsel %vm484_vm1, %v483_v32, 0.0 }
 0x112   : > { %501 = vadd.xlane.f32.xlu1 %v500_v20 }
 0x114   : > { %522 = vadd.xlane.f32.xlu0 %v521_v23 }
 0x116   : > { %525 = vadd.xlane.f32.xlu1 %v524_v26 }
 0x118   : > { %504 = vadd.xlane.f32.xlu0 %v503_v29 }
 0x11a   : > { %507 = vadd.xlane.f32.xlu1 %v506_v31 }
 0x11c   : > { %528 = vadd.xlane.f32.xlu0 %v527_v33 }
 0x11e   : > { %531 = vadd.xlane.f32.xlu1 %v530_v34 }
 0x18d   : > { %v490_v36 = vpop.xlane.xlu0 %489 }
 0x18e   : > { %v536_v38 = vadd.f32 %v534_v35, %v490_v36 }
 0x18f   : > { %v514_v37 = vpop.xlane.xlu1 %513 }
 0x190   : > { %v544_v39 = vadd.f32 %v534_v35, %v514_v37  ;;  %552 = vst [vmem:[%s1024_s24 + $0x8] sm:$0xff] %v536_v38 }
 0x191   : > { %v487_v40 = vpop.xlane.xlu0 %486 }
 0x192   : > { %560 = vst [vmem:[%s1024_s24 + $0x48] sm:$0xff] %v544_v39  ;;  %v535_v42 = vadd.f32 %v534_v35, %v487_v40 }
 0x193   : > { %v496_v41 = vpop.xlane.xlu1 %495 }
 0x194   : > { %v538_v43 = vadd.f32 %v534_v35, %v496_v41  ;;  %551 = vst [vmem:[%s1024_s24] sm:$0xff] %v535_v42 }
 0x195   : > { %v511_v44 = vpop.xlane.xlu0 %510 }
 0x196   : > { %554 = vst [vmem:[%s1024_s24 + $0x18] sm:$0xff] %v538_v43  ;;  %v543_v46 = vadd.f32 %v534_v35, %v511_v44 }
 0x197   : > { %v520_v45 = vpop.xlane.xlu1 %519 }
 0x198   : > { %v546_v47 = vadd.f32 %v534_v35, %v520_v45  ;;  %559 = vst [vmem:[%s1024_s24 + $0x40] sm:$0xff] %v543_v46 }
 0x199   : > { %v517_v48 = vpop.xlane.xlu0 %516 }
 0x19a   : > { %562 = vst [vmem:[%s1024_s24 + $0x58] sm:$0xff] %v546_v47  ;;  %v545_v50 = vadd.f32 %v534_v35, %v517_v48 }
 0x19b   : > { %v493_v49 = vpop.xlane.xlu1 %492 }
 0x19c   : > { %v537_v51 = vadd.f32 %v534_v35, %v493_v49  ;;  %561 = vst [vmem:[%s1024_s24 + $0x50] sm:$0xff] %v545_v50 }
 0x19d   : > { %v499_v52 = vpop.xlane.xlu0 %498 }
 0x19e   : > { %553 = vst [vmem:[%s1024_s24 + $0x10] sm:$0xff] %v537_v51  ;;  %v539_v54 = vadd.f32 %v534_v35, %v499_v52 }
 0x19f   : > { %v502_v53 = vpop.xlane.xlu1 %501 }
 0x1a0   : > { %v540_v55 = vadd.f32 %v534_v35, %v502_v53  ;;  %555 = vst [vmem:[%s1024_s24 + $0x20] sm:$0xff] %v539_v54 }
 0x1a1   : > { %v523_v56 = vpop.xlane.xlu0 %522 }
 0x1a2   : > { %556 = vst [vmem:[%s1024_s24 + $0x28] sm:$0xff] %v540_v55  ;;  %v547_v58 = vadd.f32 %v534_v35, %v523_v56 }
 0x1a3   : > { %v526_v57 = vpop.xlane.xlu1 %525 }
 0x1a4   : > { %v548_v59 = vadd.f32 %v534_v35, %v526_v57  ;;  %563 = vst [vmem:[%s1024_s24 + $0x60] sm:$0xff] %v547_v58 }
 0x1a5   : > { %v505_v60 = vpop.xlane.xlu0 %504 }
 0x1a6   : > { %564 = vst [vmem:[%s1024_s24 + $0x68] sm:$0xff] %v548_v59  ;;  %v541_v62 = vadd.f32 %v534_v35, %v505_v60 }
 0x1a7   : > { %v508_v61 = vpop.xlane.xlu1 %507 }
 0x1a8   : > { %v542_v63 = vadd.f32 %v534_v35, %v508_v61  ;;  %557 = vst [vmem:[%s1024_s24 + $0x30] sm:$0xff] %v541_v62 }
 0x1a9   : > { %v529_v0 = vpop.xlane.xlu0 %528 }
 0x1aa   : > { %558 = vst [vmem:[%s1024_s24 + $0x38] sm:$0xff] %v542_v63  ;;  %v549_v2 = vadd.f32 %v534_v35, %v529_v0 }
 0x1ab   : > { %v532_v1 = vpop.xlane.xlu1 %531 }
 0x1ac   : > { %v550_v3 = vadd.f32 %v534_v35, %v532_v1  ;;  %565 = vst [vmem:[%s1024_s24 + $0x70] sm:$0xff] %v549_v2 }
 0x1ae   : > { %566 = vst [vmem:[%s1024_s24 + $0x78] sm:$0xff] %v550_v3 }
 0x1af   : > { %805 = shalt.err (!%p802_p3)
}
 0x1b0   : > { %s806_s13 = scalar_lea.hbm %s1045_s8, 2048  ;;  %s810_s16 = scalar_lea.hbm %s1099_s5, 4096 }
 0x1b1   : > { %p807_p4 = scmp.ne.s32.totalorder %s1045_s8, %s806_s13  ;;  %p811_p9 = scmp.lt.u32.totalorder %s1045_s8, %s1099_s5 }
 0x1b2   : > { %p812_p10 = scmp.lt.u32.totalorder %s810_s16, %s806_s13  ;;  %p814_p12 = scmp.lt.u32.totalorder %s806_s13, %s1045_s8 }
 0x1b3   : > { %p808_p7 = pnand %p807_p4, %p930_p5 }
 0x1b4   : > { %p813_p11 = por %p812_p10, %p811_p9 }
 0x1b5   : > { %p809_p8 = pneg %p808_p7 }
 0x1b6   : > { %p815_p13 = por %p814_p12, %p813_p11 }
 0x1b8   : > { %p816_p0 = pnand %p815_p13, %p809_p8 }
 0x1ba   : > { %819 = shalt.err (!%p816_p0)
}
 0x1bb   : > { %s857_s19 = smov 128   ;;  %s858_s24 = smov 8  }
 0x1bc   : > { %719 = dma.vmem_to_hbm [thread:$0]  (%p930_p5), %s1047_s27, 2048, %s1045_s8, %s1053_s4, %s857_s19, %s857_s19, %s858_s24  }
 0x1bd PF: > { %p725_p1 = scmp.ge.s32.totalorder %s854_s23, 2  ;;  %s596_s26 = sand.u32 1, %s842_s20  }
 0x1be   : > { %s597_s6 = scalar_lea.sflag [#allocation4], %s596_s26 }
 0x1bf   : > { %p722_p2 = pnand %p725_p1, %p934_p6 }
 0x1c1   : > { %837 = dma.done.wait (!%p722_p2), %s597_s6, 2048  }
 0x1c2   : > { %839 = vsyncadd (!%p722_p2), %s597_s6, 4294965248  ;;  %p16_p3 = scmp.ge.s32.totalorder %s917_s25, 4   ;;  %s1102_s20 = smov %s846_s21 }
 0x1c3   : > { %s1103_s21 = smov %s850_s22  ;;  %s1104_s22 = smov %s928_s28 }
 0x1c4   : > { %s1105_s23 = smov %s917_s25  ;;  %18 = sbr.rel (!%p16_p3) target bundleno = 5 (0x5), region = 75 }
 0x1cb   :  { %602 = vsyncpa [#allocation4], 1 }
 0x1cc   :  { %604 = vsyncpa [#allocation4 + $0x1], 1 }

</bundles_post_ra>
